<compile_context>
chip_gen: v7x
topology: tpu7x:2x2x1
jax: 0.10.0
libtpu: 0.0.40
codegen_flags: <defaults>
</compile_context>

<pallas_src>
import functools

import numpy as np
import jax
import jax.numpy as jnp
from jax.experimental import pallas as pl
from jax.experimental.pallas import tpu as pltpu


# ----------------------------------------------------------------------------
# Init-time constant operator construction (pure numpy float64, runs once)
# ----------------------------------------------------------------------------
def _build_deconv_matrix(w_deconv, H, W):
    """ConvTranspose2d (stride == kernel, pad=0, no bias) as a matrix.

    w_deconv: (Cin, Cout, KH, KW)  (PyTorch ConvTranspose2d weight layout).
    Returns (M1, (Cout, Ho, Wo)) with M1 shape (Cin*H*W, Cout*Ho*Wo) such that
        v2.reshape(N, -1) == x.reshape(N, -1) @ M1
    for NCHW-contiguous x of shape (N, Cin, H, W).
    """
    wd = np.asarray(jax.device_get(w_deconv), dtype=np.float64)
    Cin, Cout, KH, KW = wd.shape
    Ho, Wo = H * KH, W * KW                      # stride == kernel, padding 0
    m = np.zeros((Cin, H, W, Cout, Ho, Wo), dtype=np.float64)
    for h in range(H):
        for w in range(W):
            # v2[co, h*KH+kh, w*KW+kw] += x[ci, h, w] * wd[ci, co, kh, kw]
            m[:, h, w, :, h * KH:(h + 1) * KH, w * KW:(w + 1) * KW] = wd
    return m.reshape(Cin * H * W, Cout * Ho * Wo), (Cout, Ho, Wo)


def _build_conv_matrix(w_conv, C, H, W, stride, padding):
    """Conv2d (no bias) as a matrix acting on a flattened NCHW feature map.

    w_conv: (Cout, Cin, KH, KW) (PyTorch Conv2d weight layout), Cin == C.
    Returns (M2, (Cout, OH, OW)) with M2 shape (C*H*W, Cout*OH*OW) such that
        v1.reshape(N, -1) == v2.reshape(N, -1) @ M2.
    Zero padding and the im2col gather are folded into the matrix.
    """
    wc = np.asarray(jax.device_get(w_conv), dtype=np.float64)
    Cout, Cin, KH, KW = wc.shape
    assert Cin == C, (Cin, C)
    OH = (H + 2 * padding - KH) // stride + 1
    OW = (W + 2 * padding - KW) // stride + 1
    m = np.zeros((C, H, W, Cout, OH, OW), dtype=np.float64)
    for o in range(Cout):
        for c in range(C):
            for kh in range(KH):
                for kw in range(KW):
                    for oh in range(OH):
                        i = oh * stride + kh - padding
                        if not (0 <= i < H):
                            continue
                        for ow in range(OW):
                            j = ow * stride + kw - padding
                            if not (0 <= j < W):
                                continue
                            m[c, i, j, o, oh, ow] += wc[o, c, kh, kw]
    return m.reshape(C * H * W, Cout * OH * OW), (Cout, OH, OW)


# ----------------------------------------------------------------------------
# Fused Pallas kernel: single folded matmul -> clamp (one launch, one MXU pass)
# ----------------------------------------------------------------------------
def _fused_kernel(x_ref, m_ref, clamp_ref, o_ref):
    # Single matmul: deconv scatter + zero pad + im2col + conv are all folded
    # into the constant operand m_ref at init time.
    y = jnp.dot(x_ref[...], m_ref[...], preferred_element_type=jnp.float32)
    lo = clamp_ref[0]                      # SMEM scalar: clamp_min bound
    hi = clamp_ref[1]                      # SMEM scalar: clamp_max bound
    y = jnp.maximum(y, lo)                 # torch.clamp_min
    y = jnp.minimum(y, hi)                 # torch.clamp_max (order preserved)
    o_ref[...] = y


@functools.partial(jax.jit, static_argnames=("n_valid", "out_chw"))
def _fused_forward(x, m_padded, clamp_vals, n_valid, out_chw):
    N = x.shape[0]
    x2d = x.reshape(N, -1)                 # contiguous NCHW flatten: free view
    n_pad = m_padded.shape[1]              # 128 lane-dense output columns
    vmem = pl.BlockSpec(memory_space=pltpu.MemorySpace.VMEM)
    smem = pl.BlockSpec(memory_space=pltpu.MemorySpace.SMEM)
    y = pl.pallas_call(
        _fused_kernel,
        out_shape=jax.ShapeDtypeStruct((N, n_pad), jnp.float32),
        in_specs=[vmem, vmem, smem],
        out_specs=vmem,
    )(x2d, m_padded, clamp_vals)
    # Drop the zero-padded lanes, then a free contiguous NCHW unflatten.
    return y[:, :n_valid].reshape((N,) + out_chw)


# ----------------------------------------------------------------------------
# Model
# ----------------------------------------------------------------------------
class Model:
    """JAX/Pallas port of the PyTorch module (forward pass only)."""

    def __init__(self, min_value=0, max_value=0, key=jax.random.PRNGKey(0),
                 in_shape=(6, 5, 1)):
        k1, k2 = jax.random.split(key)
        Cin, H, W = in_shape
        # ConvTranspose2d(6, 3, 4, stride=4, bias=False) weight: (in=6, out=3, 4, 4)
        self.w_deconv = jax.random.uniform(
            k1, (Cin, 3, 4, 4), jnp.float32, minval=-1.0, maxval=1.0
        ) / jnp.sqrt(jnp.float32(3 * 4 * 4))
        # Conv2d(3, 5, 2, stride=3, padding=2, bias=False) weight: (out=5, in=3, 2, 2)
        self.w_conv = jax.random.uniform(
            k2, (5, 3, 2, 2), jnp.float32, minval=-1.0, maxval=1.0
        ) / jnp.sqrt(jnp.float32(3 * 2 * 2))
        self.min_value = float(min_value)
        self.max_value = float(max_value)
        self.in_shape = tuple(in_shape)

        # Fold all layout work AND both linear operators into a single matmul
        # operand, computed in float64 then cast to f32 (keeps the fold within
        # 1e-5 of the two-matmul reference).
        m1, mid_chw = _build_deconv_matrix(self.w_deconv, H, W)
        m2, self.out_chw = _build_conv_matrix(self.w_conv, *mid_chw,
                                              stride=3, padding=2)
        m_folded = (m1 @ m2).astype(np.float32)          # (30, 120)
        self.n_valid = m_folded.shape[1]
        # Pad the lane (output) dim up to a multiple of 128 -> unmasked stores.
        n_pad = ((self.n_valid + 127) // 128) * 128
        m_padded = np.zeros((m_folded.shape[0], n_pad), dtype=np.float32)
        m_padded[:, :self.n_valid] = m_folded
        self.m = jnp.asarray(m_padded)                   # (30, 128)

        # Clamp bounds as a tiny SMEM operand: no recompile per (min, max).
        self.clamp_vals = jnp.asarray([self.min_value, self.max_value],
                                      dtype=jnp.float32)

    def __call__(self, x):
        assert x.shape[1:] == self.in_shape, x.shape
        if self.min_value >= self.max_value:
            # clamp_min(y, lo) then clamp_max(., hi) with lo >= hi is the
            # constant hi everywhere -> skip the matmul entirely
            # (the spec-default min=max=0 configuration).
            return jnp.full((x.shape[0],) + self.out_chw,
                            jnp.float32(self.max_value))
        return _fused_forward(x, self.m, self.clamp_vals,
                              self.n_valid, self.out_chw)


# ----------------------------------------------------------------------------
# Reference (pure JAX) for correctness checking
# ----------------------------------------------------------------------------
def _reference(x, w_deconv, w_conv, min_value, max_value):
    N, Cin, H, W = x.shape
    _, Cout, KH, KW = w_deconv.shape
    # ConvTranspose2d with stride == kernel, padding 0
    v2 = jnp.einsum('nchw,cokl->nohkwl', x, w_deconv).reshape(
        N, Cout, H * KH, W * KW)
    v1 = jax.lax.conv_general_dilated(
        v2, w_conv, window_strides=(3, 3), padding=((2, 2), (2, 2)),
        dimension_numbers=('NCHW', 'OIHW', 'NCHW'))
    return jnp.minimum(jnp.maximum(v1, min_value), max_value)


if __name__ == "__main__":
    key = jax.random.PRNGKey(0)
    k_model, k_x = jax.random.split(key)
    x3 = jax.random.normal(k_x, (1, 6, 5, 1), jnp.float32)

    # Non-degenerate clamp bounds: exercises the fused Pallas kernel path.
    model = Model(min_value=-0.05, max_value=0.05, key=k_model)
    out = jax.block_until_ready(model(x3))
    assert out.shape == (1, 5, 8, 3), out.shape
    ref = _reference(x3, model.w_deconv, model.w_conv,
                     model.min_value, model.max_value)
    assert jnp.allclose(out, ref, atol=1e-5, rtol=1e-5), "mismatch vs reference"

    # Spec-default configuration (min=max=0): trace-time constant short-circuit.
    model0 = Model(min_value=0, max_value=0, key=k_model)
    out0 = jax.block_until_ready(model0(x3))
    assert out0.shape == (1, 5, 8, 3), out0.shape
    ref0 = _reference(x3, model0.w_deconv, model0.w_conv, 0.0, 0.0)
    assert jnp.allclose(out0, ref0, atol=1e-5, rtol=1e-5), "mismatch vs reference"

    print("KERNEL_OK")
</pallas_src>

<mosaic_0001>
module attributes {stable_mosaic.version = 11 : i64} {
  func.func @_fused_kernel(%arg0: memref<1x30xf32, #tpu.memory_space<vmem>>, %arg1: memref<30x128xf32, #tpu.memory_space<vmem>>, %arg2: memref<2xf32, #tpu.memory_space<smem>>, %arg3: memref<1x128xf32, #tpu.memory_space<vmem>>) attributes {dimension_semantics = [], scalar_prefetch = 0 : i64, scratch_operands = 0 : i64, tpu.core_type = #tpu.core_type<tc>} {
    %c0 = arith.constant 0 : index
    %c0_0 = arith.constant 0 : index
    %0 = vector.load %arg0[%c0, %c0_0] : memref<1x30xf32, #tpu.memory_space<vmem>>, vector<1x30xf32>
    %c0_1 = arith.constant 0 : index
    %c0_2 = arith.constant 0 : index
    %1 = vector.load %arg1[%c0_1, %c0_2] : memref<30x128xf32, #tpu.memory_space<vmem>>, vector<30x128xf32>
    %cst = arith.constant dense<0.000000e+00> : vector<1x128xf32>
    %2 = tpu.matmul %0, %1, %cst {dimension_numbers = #tpu.dot_dimension_numbers<[1], [0], [0], [1], [0, 0, 1, 1], [], []>} : vector<1x30xf32>, vector<30x128xf32>, vector<1x128xf32> -> vector<1x128xf32>
    %c0_3 = arith.constant 0 : index
    %3 = memref.load %arg2[%c0_3] : memref<2xf32, #tpu.memory_space<smem>>
    %c1 = arith.constant 1 : index
    %4 = memref.load %arg2[%c1] : memref<2xf32, #tpu.memory_space<smem>>
    %5 = vector.broadcast %3 : f32 to vector<1x128xf32>
    %6 = arith.maximumf %2, %5 : vector<1x128xf32>
    %7 = vector.broadcast %4 : f32 to vector<1x128xf32>
    %8 = arith.minimumf %6, %7 : vector<1x128xf32>
    %c0_4 = arith.constant 0 : index
    %c0_5 = arith.constant 0 : index
    %9 = vector.load %arg3[%c0_4, %c0_5] : memref<1x128xf32, #tpu.memory_space<vmem>>, vector<1x128xf32>
    tpu.vector_store %arg3[%c0_4, %c0_5], %8 {strides = array<i32>} : memref<1x128xf32, #tpu.memory_space<vmem>>, vector<1x128xf32>,
    return
  }
}

</mosaic_0001>

<bundles_post_ra>
// kernel: _fused_forward.1
= control target key start
LH: loop header
LB: loop body
LE: loop exit
PB: predicated region body
PF: predicated region fallthrough
CT: control target
= control target key end

     0   :  { %8 = vsyncpa [#allocation3], 0  ;;  %s258_s0 = inlined_call_operand.vmem [shape: f32[1,30], index: 0, kind: input, shape index: {}]   ;;  %s259_s1 = inlined_call_operand.hbm [shape: f32[30,128], index: 1, kind: input, shape index: {}]   ;;  %s260_s2 = inlined_call_operand.vmem [shape: f32[2], index: 2, kind: input, shape index: {}]   ;;  %s261_s3 = inlined_call_operand.vmem [shape: f32[1,128], index: 3, kind: output, shape index: {}]  }
   0x1   :  { %9 = vsyncpa [#allocation4], 0  ;;  %s209_s12 = smov [#allocation2]   ;;  %s30_s16 = sshll.u32 %s260_s2, 4  ;;  %s31_s16 = int_to_ptr.vmem [resolvable:$true] %s30_s16 }
   0x2   :  { %s17_s13 = sshll.u32 %s209_s12, 4  ;;  %s171_s19 = scalar_lea.hbm %s259_s1, 512  ;;  %s18_s13 = int_to_ptr.vmem [resolvable:$true] %s17_s13 }
   0x3   :  { %p172_p0 = scmp.ne.s32.totalorder %s259_s1, %s171_s19  ;;  %p175_p1 = scmp.lt.u32.totalorder %s171_s19, %s259_s1 }
   0x5   :  { %p177_p2 = pnand %p175_p1, %p172_p0 }
   0x7   :  { %180 = shalt.err (!%p177_p2)
}
   0x8   :  { %s181_s24 = scalar_lea.vmem %s18_s13, 512  ;;  %p186_p4 = scmp.lt.s32.totalorder %s18_s13, %s18_s13 }
   0x9   :  { %p182_p3 = scmp.ne.s32.totalorder %s18_s13, %s181_s24  ;;  %p187_p5 = scmp.lt.s32.totalorder %s181_s24, %s181_s24 }
   0xb   :  { %p188_p6 = por %p187_p5, %p186_p4 }
   0xd   :  { %p189_p7 = pnand %p188_p6, %p182_p3 }
   0xf   :  { %192 = shalt.err (!%p189_p7)
}
  0x10   :  { %s210_s2 = smov 128   ;;  %s211_s25 = smov 8  }
  0x11   :  { %23 = dma.hbm_to_vmem [thread:$0]  %s259_s1, 512, %s18_s13, [#allocation3], %s210_s2, %s210_s2, %s211_s25  }
  0x12   :  { %s193_s28 = scalar_lea.vmem %s31_s16, 16  ;;  %p198_p9 = scmp.lt.s32.totalorder %s31_s16, %s31_s16 }
  0x13   :  { %p194_p8 = scmp.ne.s32.totalorder %s31_s16, %s193_s28  ;;  %p199_p10 = scmp.lt.s32.totalorder %s193_s28, %s193_s28 }
  0x15   :  { %p200_p11 = por %p199_p10, %p198_p9 }
  0x17   :  { %p201_p12 = pnand %p200_p11, %p194_p8 }
  0x19   :  { %204 = shalt.err (!%p201_p12)
}
  0x1a   :  { %s212_s29 = smov [#allocation5]  }
  0x1b   :  { %33 = dma.vmem_to_smem %s31_s16, 16, %s212_s29, [#allocation4]  }
  0x1c   :  { %205 = dma.done.wait [#allocation3], 512  }
  0x1d   :  { %206 = vsyncadd [#allocation3], 4294966784 }
  0x1e   :  { %207 = dma.done.wait [#allocation4], 16  }
  0x1f   :  { %208 = vsyncadd [#allocation4], 4294967280 }
  0x20   :  { %40 = sfence }
  0x21   :  { %v42_v0 = vld [vmem:[#allocation2] sm:$0xff]  ;;  %v43_v1 = vld [vmem:[#allocation2 + $0x8] sm:$0xff]  ;;  %v44_v2 = vld [vmem:[#allocation2 + $0x10] sm:$0xff]  ;;  %vm50_vm0 = vcmask 1045504   ;;  %v213_v3 = vmov 0.0|0.0   ;;  %vm214_vm1 = vmmov 0  }
  0x22   :  { %156 = vmatprep.subr.bf16.mxu0 %v213_v3  ;;  %v157_v4 = vpack.c.bf16 %v43_v1, %v42_v0  ;;  %v45_v5 = vld [vmem:[#allocation2 + $0x18] sm:$0x3f]  ;;  %v215_v6 = vmov 0.0   ;;  %vm216_vm2 = vmmov 1   ;;  %v41_v8 = vld [vmem:[%s258_s0] sm:$0x1] }
  0x23   :  { %153 = vmatprep.mubr.msk.f32.mxu0 %vm214_vm1, %v215_v6  ;;  %v160_v7 = vpack.c.bf16 %v45_v5, %v44_v2  ;;  %vm161_vm3 = vmpackc.low %vm50_vm0, %vm216_vm2  ;;  %vm46_vm4 = vcmask 244736   ;;  %s124_s4 = sld [smem:[#allocation5]]  ;;  %s139_s5 = sld [smem:[#allocation5 + $0x1]] }
  0x24   :  { %158 = vmatpush3.bf16.msra.mxu0 %v157_v4 }
  0x25   :  { %159 = vmatprep.subr.bf16.mxu0 %v213_v3 }
  0x28   :  { %162 = vmatpush3.bf16.msk.msra.mxu0 %vm161_vm3, %v160_v7 }
  0x29   :  { %v126_v9 = vstv %s124_s4  ;;  %v128_v11 = vstv %s139_s5 }
  0x2b   :  { %154 = vmatmul.mubr.msk.f32.vlgmr.msra.gmra.mrb[0].mxu0 %vm46_vm4, %v41_v8 }
  0xfe   :  { %v120_v10 = vpop.f32.mrb[0].mxu0 }
  0xff   :  { %v127_v12 = vmax.f32 %v120_v10, %v126_v9  ;;  %v155_v13 = vpop.f32.mrb[1].mxu0 }
 0x101   :  { %v129_v14 = vmin.f32 %v127_v12, %v128_v11 }
 0x103   :  { %130 = vst [vmem:[%s261_s3] sm:$0x1] %v129_v14 }
 0x104   :  { %135 = vsyncpa [#allocation3], 1 }
 0x105   :  { %136 = vsyncpa [#allocation4], 1 }

</bundles_post_ra>
